<compile_context>
chip_gen: v6e
topology: v6e:2x2x1
jax: 0.10.0
libtpu: 0.0.40
codegen_flags: <defaults>
</compile_context>

<pallas_src>
import jax
import jax.numpy as jnp
from jax.experimental import pallas as pl
from jax.experimental.pallas import tpu as pltpu


def _dwconv1d_kernel(x_ref, w_ref, b_ref, o_ref):
    """Depthwise conv over one (Rb, L) row-block.

    x_ref : (Rb, L)      folded (batch*channel) rows of the input
    w_ref : (Rb, K)      per-row filter taps
    b_ref : (Rb, 1)      per-row bias
    o_ref : (Rb, L_out)  output rows
    """
    Rb, L = x_ref.shape
    L_out = o_ref.shape[-1]
    K = w_ref.shape[-1]
    pad = (K - 1) // 2

    x = x_ref[...].astype(jnp.float32)            # (Rb, L)
    w = w_ref[...].astype(jnp.float32)            # (Rb, K)
    b = b_ref[...].astype(jnp.float32)            # (Rb, 1)

    # Column index, hoisted out of the tap loop (used only for edge masks).
    col = jax.lax.broadcasted_iota(jnp.int32, (Rb, L_out), 1)

    # Register-resident accumulator, initialized with the bias.  All taps are
    # value-semantics ops, so Mosaic keeps the chain in vregs per chunk and
    # the output is stored exactly once (no per-tap masked RMW of VMEM).
    acc = jnp.broadcast_to(b, (Rb, L_out))

    for j in range(K):                            # K is small & static
        off = j - pad                             # input offset of this tap
        lo = max(0, -off)                         # first valid output column
        hi = min(L_out, L - off)                  # one past last valid column
        if hi <= lo:
            continue                              # tap lies entirely in the halo
        # Align x[:, i + off] with output column i via an XLU lane rotation.
        xs = x if off == 0 else pltpu.roll(x, (-off) % L, axis=1)
        if L_out != L:                            # even K: L_out = L - 1
            xs = xs[:, :L_out]
        # Zero columns that fall in the implicit zero halo (also kills the
        # wrapped-around lanes of the rotation).
        if lo > 0 or hi < L_out:
            xs = jnp.where((col >= lo) & (col < hi), xs, 0.0)
        acc = acc + xs * w[:, j:j + 1]

    o_ref[...] = acc.astype(o_ref.dtype)


def _vmem_capacity_bytes():
    try:
        info = pltpu.get_tpu_info()
        cap = int(getattr(info, "vmem_capacity_bytes", 0))
        if cap > 0:
            return cap
    except Exception:
        pass
    return 64 * 2**20   # conservative default (v7x has 64 MiB per TensorCore)


def _pick_row_block(R, L, L_out, K, itemsize, vmem_cap):
    """Row block: sublane-aligned, VMEM-budgeted, >= 2 grid steps when possible."""
    sub = max(8, 32 // max(1, itemsize))          # 8 (f32) / 16 (bf16) / 32 (int8)
    r_ceil = pl.cdiv(R, sub) * sub

    # Per-block budget: generous on 128 MiB chips (v5e/v6e), tighter on v7x.
    budget = min(16 * 2**20, max(2 * 2**20, vmem_cap // 8))
    per_row = (L + L_out + K + 1) * itemsize + 2 * L_out * 4   # IO + f32 working set
    rb = (budget // max(1, per_row)) // sub * sub
    rb = max(sub, min(rb, 1024, r_ceil))

    # Keep at least 2 grid steps so both TensorCores get work on v7x.
    if r_ceil >= 2 * sub and pl.cdiv(r_ceil, rb) < 2:
        rb = pl.cdiv(pl.cdiv(r_ceil, 2), sub) * sub

    # Re-balance: same step count, minimal row padding.
    steps = pl.cdiv(r_ceil, rb)
    rb = pl.cdiv(pl.cdiv(r_ceil, steps), sub) * sub
    return rb


def depthwise_conv1d(x, w, b, kernel_size):
    """Depthwise Conv1d.  x: (N, C, L), w: (C, K), b: (C,) -> (N, C, L_out)."""
    N, C, L = x.shape
    K = kernel_size
    pad = (K - 1) // 2
    L_out = L + 2 * pad - K + 1

    # Fold batch & channels into one row axis so blocks stay sublane-dense even
    # for tiny C; the per-channel weights/bias are tiled to match (negligible).
    R = N * C
    xr = x.reshape(R, L)
    wr = jnp.tile(w, (N, 1))                      # (R, K)
    br = jnp.tile(b.reshape(C, 1), (N, 1))        # (R, 1)

    itemsize = jnp.dtype(x.dtype).itemsize
    vmem_cap = _vmem_capacity_bytes()
    Rb = _pick_row_block(R, L, L_out, K, itemsize, vmem_cap)
    R_pad = pl.cdiv(R, Rb) * Rb
    if R_pad != R:
        xr = jnp.pad(xr, ((0, R_pad - R), (0, 0)))
        wr = jnp.pad(wr, ((0, R_pad - R), (0, 0)))
        br = jnp.pad(br, ((0, R_pad - R), (0, 0)))

    grid = (R_pad // Rb,)

    # Chip-aware scoped-VMEM request: double-buffered in/out blocks + slack,
    # clamped well below physical capacity (64 MiB on v7x, 128 MiB on v5e/v6e).
    block_bytes = Rb * (L + L_out + K + 1) * itemsize
    vmem_limit = min(int(0.75 * vmem_cap),
                     max(16 * 2**20, 4 * block_bytes + 2 * 2**20))
    vmem_limit = int(max(vmem_limit, 8 * 2**20))

    out = pl.pallas_call(
        _dwconv1d_kernel,
        out_shape=jax.ShapeDtypeStruct((R_pad, L_out), x.dtype),
        grid_spec=pltpu.PrefetchScalarGridSpec(
            num_scalar_prefetch=0,
            grid=grid,
            in_specs=[
                pl.BlockSpec((Rb, L), lambda r: (r, 0)),
                pl.BlockSpec((Rb, K), lambda r: (r, 0)),
                pl.BlockSpec((Rb, 1), lambda r: (r, 0)),
            ],
            out_specs=pl.BlockSpec((Rb, L_out), lambda r: (r, 0)),
        ),
        compiler_params=pltpu.CompilerParams(
            dimension_semantics=("parallel",),
            vmem_limit_bytes=vmem_limit,
        ),
    )(xr, wr, br)

    return out[:R].reshape(N, C, L_out)


def _reference(x, w, b, kernel_size):
    # Pure-JAX reference (depthwise conv via lax.conv_general_dilated).
    C = x.shape[1]
    pad = (kernel_size - 1) // 2
    out = jax.lax.conv_general_dilated(
        x, w[:, None, :],                         # (C, 1, K)
        window_strides=(1,),
        padding=[(pad, pad)],
        dimension_numbers=("NCH", "OIH", "NCH"),
        feature_group_count=C,
    )
    return out + b[None, :, None]


if __name__ == "__main__":
    def run_case(key, N, C, L, K):
        kx, kw, kb = jax.random.split(key, 3)
        x = jax.random.normal(kx, (N, C, L), dtype=jnp.float32)
        # PyTorch Conv1d default init: U(-s, s), s = 1/sqrt(fan_in)
        fan_in = 1 * K  # in_channels / groups * kernel_size
        s = 1.0 / (fan_in ** 0.5)
        w = jax.random.uniform(kw, (C, K), minval=-s, maxval=s, dtype=jnp.float32)
        b = jax.random.uniform(kb, (C,), minval=-s, maxval=s, dtype=jnp.float32)

        y = jax.block_until_ready(depthwise_conv1d(x, w, b, K))
        y_ref = _reference(x, w, b, K)
        assert y.shape == y_ref.shape, (y.shape, y_ref.shape)
        assert jnp.allclose(y, y_ref, atol=1e-5, rtol=1e-5), \
            f"mismatch vs reference (N={N} C={C} L={L} K={K})"

    key = jax.random.PRNGKey(0)
    k1, k2, k3 = jax.random.split(key, 3)
    run_case(k1, 2, 4, 16, 3)       # module-scale smoke test (row folding, tiny C)
    run_case(k2, 2, 256, 384, 5)    # exercises multi-step grid + lane-dense rows
    run_case(k3, 1, 4, 16, 4)       # even kernel size (L_out = L - 1), row padding

    print("KERNEL_OK")
</pallas_src>

<mosaic_0001>
module attributes {stable_mosaic.version = 11 : i64} {
  func.func @_dwconv1d_kernel(%arg0: i32, %arg1: memref<8x16xf32, #tpu.memory_space<vmem>>, %arg2: memref<8x3xf32, #tpu.memory_space<vmem>>, %arg3: memref<8x1xf32, #tpu.memory_space<vmem>>, %arg4: memref<8x16xf32, #tpu.memory_space<vmem>>) attributes {dimension_semantics = [#tpu.dimension_semantics<parallel>], iteration_bounds = array<i64: 1>, scalar_prefetch = 0 : i64, scratch_operands = 0 : i64, tpu.core_type = #tpu.core_type<tc>, window_params = [{transform_indices = @transform_0, window_bounds = array<i64: 8, 16>}, {transform_indices = @transform_1, window_bounds = array<i64: 8, 3>}, {transform_indices = @transform_2, window_bounds = array<i64: 8, 1>}, {transform_indices = @transform_3, window_bounds = array<i64: 8, 16>}]} {
    %c0 = arith.constant 0 : index
    %c0_0 = arith.constant 0 : index
    %0 = vector.load %arg1[%c0, %c0_0] : memref<8x16xf32, #tpu.memory_space<vmem>>, vector<8x16xf32>
    %c0_1 = arith.constant 0 : index
    %c0_2 = arith.constant 0 : index
    %1 = vector.load %arg2[%c0_1, %c0_2] : memref<8x3xf32, #tpu.memory_space<vmem>>, vector<8x3xf32>
    %c0_3 = arith.constant 0 : index
    %c0_4 = arith.constant 0 : index
    %2 = vector.load %arg3[%c0_3, %c0_4] : memref<8x1xf32, #tpu.memory_space<vmem>>, vector<8x1xf32>
    %3 = tpu.iota {dimensions = array<i32: 1>} : vector<8x16xi32>
    %4 = vector.shape_cast %2 : vector<8x1xf32> to vector<8x1xf32>
    %5 = vector.broadcast %4 : vector<8x1xf32> to vector<8x16xf32>
    %c1_i32 = arith.constant 1 : i32
    %6 = tpu.dynamic_rotate %0 by %c1_i32 dim 1 : vector<8x16xf32>, i32 -> vector<8x16xf32>
    %c1_i32_5 = arith.constant 1 : i32
    %7 = vector.broadcast %c1_i32_5 : i32 to vector<8x16xi32>
    %8 = arith.cmpi sge, %3, %7 : vector<8x16xi32>
    %c16_i32 = arith.constant 16 : i32
    %9 = vector.broadcast %c16_i32 : i32 to vector<8x16xi32>
    %10 = arith.cmpi slt, %3, %9 : vector<8x16xi32>
    %11 = arith.andi %8, %10 : vector<8x16xi1>
    %cst = arith.constant 0.000000e+00 : f32
    %12 = vector.broadcast %cst : f32 to vector<8x16xf32>
    %13 = arith.select %11, %6, %12 : vector<8x16xi1>, vector<8x16xf32>
    %14 = vector.extract_strided_slice %1 {offsets = [0, 0], sizes = [8, 1], strides = [1, 1]} : vector<8x3xf32> to vector<8x1xf32>
    %15 = vector.broadcast %14 : vector<8x1xf32> to vector<8x16xf32>
    %16 = arith.mulf %13, %15 : vector<8x16xf32>
    %17 = arith.addf %5, %16 : vector<8x16xf32>
    %18 = vector.extract_strided_slice %1 {offsets = [0, 1], sizes = [8, 1], strides = [1, 1]} : vector<8x3xf32> to vector<8x1xf32>
    %19 = vector.broadcast %18 : vector<8x1xf32> to vector<8x16xf32>
    %20 = arith.mulf %0, %19 : vector<8x16xf32>
    %21 = arith.addf %17, %20 : vector<8x16xf32>
    %c15_i32 = arith.constant 15 : i32
    %22 = tpu.dynamic_rotate %0 by %c15_i32 dim 1 : vector<8x16xf32>, i32 -> vector<8x16xf32>
    %c0_i32 = arith.constant 0 : i32
    %23 = vector.broadcast %c0_i32 : i32 to vector<8x16xi32>
    %24 = arith.cmpi sge, %3, %23 : vector<8x16xi32>
    %c15_i32_6 = arith.constant 15 : i32
    %25 = vector.broadcast %c15_i32_6 : i32 to vector<8x16xi32>
    %26 = arith.cmpi slt, %3, %25 : vector<8x16xi32>
    %27 = arith.andi %24, %26 : vector<8x16xi1>
    %cst_7 = arith.constant 0.000000e+00 : f32
    %28 = vector.broadcast %cst_7 : f32 to vector<8x16xf32>
    %29 = arith.select %27, %22, %28 : vector<8x16xi1>, vector<8x16xf32>
    %30 = vector.extract_strided_slice %1 {offsets = [0, 2], sizes = [8, 1], strides = [1, 1]} : vector<8x3xf32> to vector<8x1xf32>
    %31 = vector.broadcast %30 : vector<8x1xf32> to vector<8x16xf32>
    %32 = arith.mulf %29, %31 : vector<8x16xf32>
    %33 = arith.addf %21, %32 : vector<8x16xf32>
    %c0_8 = arith.constant 0 : index
    %c0_9 = arith.constant 0 : index
    %34 = vector.load %arg4[%c0_8, %c0_9] : memref<8x16xf32, #tpu.memory_space<vmem>>, vector<8x16xf32>
    tpu.vector_store %arg4[%c0_8, %c0_9], %33 {strides = array<i32>} : memref<8x16xf32, #tpu.memory_space<vmem>>, vector<8x16xf32>,
    return
  }
  func.func @transform_0(%arg0: i32) -> (i32, i32) {
    %c0_i32 = arith.constant 0 : i32
    %c0_i32_0 = arith.constant 0 : i32
    return %arg0, %c0_i32 : i32, i32
  }
  func.func @transform_1(%arg0: i32) -> (i32, i32) {
    %c0_i32 = arith.constant 0 : i32
    %c0_i32_0 = arith.constant 0 : i32
    return %arg0, %c0_i32 : i32, i32
  }
  func.func @transform_2(%arg0: i32) -> (i32, i32) {
    %c0_i32 = arith.constant 0 : i32
    %c0_i32_0 = arith.constant 0 : i32
    return %arg0, %c0_i32 : i32, i32
  }
  func.func @transform_3(%arg0: i32) -> (i32, i32) {
    %c0_i32 = arith.constant 0 : i32
    %c0_i32_0 = arith.constant 0 : i32
    return %arg0, %c0_i32 : i32, i32
  }
}

</mosaic_0001>

<bundles_post_ra>
// kernel: tpu_custom_call.1
= control target key start
LH: loop header
LB: loop body
LE: loop exit
PB: predicated region body
PF: predicated region fallthrough
CT: control target
= control target key end

     0   :  { %s115_s16 = smov 16   ;;  %v116_v2 = vmov 0   ;;  %s154_s0 = inlined_call_operand.vmem [shape: f32[8,16], index: 0, kind: input, shape index: {}]   ;;  %s155_s1 = inlined_call_operand.vmem [shape: f32[8,3], index: 1, kind: input, shape index: {}]   ;;  %s156_s2 = inlined_call_operand.vmem [shape: f32[8,1], index: 2, kind: input, shape index: {}]   ;;  %s157_s3 = inlined_call_operand.hbm [shape: f32[8,16], index: 3, kind: output, shape index: {}]  }
   0x1   :  { %v15_v0 = vld [vmem:[%s154_s0] sm:$0xff]  ;;  %89 = vset.pattern.permute.xlu1 %v116_v2 }
   0x2   :  { %v16_v1 = vld [vmem:[%s155_s1] sm:$0xff]  ;;  %26 = vrot.lane.b32.xlu0 %v15_v0, %s115_s16 }
   0x3   :  { %8 = vsyncpa [#allocation3], 0  ;;  %42 = vperm.xlu1 %89, %v16_v1   ;;  %v117_v3 = vmov 1   ;;  %v17_v4 = vld [vmem:[%s156_s2] sm:$0xff]  ;;  %v118_v5 = vmov 2   ;;  %vm25_vm0 = vcmask 1047680   ;;  %v18_v11 = vlaneseq }
   0x4   :  { %90 = vset.pattern.permute.xlu0 %v117_v3  ;;  %s119_s0 = smov 127   ;;  %s120_s1 = smov 113   ;;  %vm66_vm5 = vcmask 130048  }
   0x5   :  { %v19_v12 = vand.u32 127, %v18_v11  ;;  %s121_s2 = smov [#allocation2]  }
   0x6   :  { %s74_s19 = sshll.u32 %s121_s2, 4  ;;  %s75_s19 = int_to_ptr.vmem [resolvable:$true] %s74_s19 }
   0x7   :  { %22 = vperm.xlu1 %89, %v17_v4   ;;  %vm32_vm1 = vcmp.ge.s32.totalorder %v19_v12, 1  ;;  %vm33_vm2 = vcmp.lt.s32.totalorder %v19_v12, 16  ;;  %vm54_vm4 = vcmp.lt.s32.totalorder %v19_v12, 15  ;;  %s93_s20 = scalar_lea.vmem %s75_s19, 128  ;;  %p98_p1 = scmp.lt.s32.totalorder %s75_s19, %s75_s19 }
   0x8   :  { %vm34_vm3 = vmand %vm32_vm1, %vm33_vm2  ;;  %p94_p0 = scmp.ne.s32.totalorder %s75_s19, %s93_s20  ;;  %p99_p2 = scmp.lt.s32.totalorder %s93_s20, %s93_s20 }
   0xa   :  { %p100_p3 = por %p99_p2, %p98_p1 }
   0xb   :  { %91 = vset.pattern.permute.xlu1 %v118_v5 }
   0xc   :  { %p101_p4 = pnand %p100_p3, %p94_p0 }
  0x74   :  { %v27_v6 = vpop.permute.xlu0 %26 }
  0x75   :  { %v28_v7 = vsel %vm25_vm0, %v27_v6, %v15_v0 }
  0x76   :  { %29 = vrot.lane.b32.xlu0 %v28_v7, %s115_s16 }
  0x7a   :  { %48 = vperm.xlu0 %90, %v16_v1  }
  0x7e   :  { %92 = vset.pattern.permute.xlu0 %v118_v5  ;;  %v43_v10 = vpop.permute.xlu1 %42 }
  0x82   :  { %v23_v13 = vpop.permute.xlu1 %22 }
  0xe8   :  { %v30_v8 = vpop.permute.xlu0 %29 }
  0xe9   :  { %v31_v9 = vsel %vm25_vm0, %v30_v8, %v15_v0 }
  0xea   :  { %56 = vrot.lane.b32.xlu0 %v31_v9, %s119_s0  ;;  %36 = vrot.lane.b32.xlu1 %v31_v9, %s120_s1 }
  0xee   :  { %61 = vperm.xlu1 %91, %v16_v1  }
  0xf5   :  { %v49_v16 = vpop.permute.xlu0 %48 }
  0xf6   :  { %v51_v18 = vmul.f32 %v49_v16, %v15_v0 }
 0x15c   :  { %v37_v14 = vpop.permute.xlu1 %36  ;;  %v57_v20 = vpop.permute.xlu0 %56 }
 0x15d   :  { %v39_v15 = vsel %vm34_vm3, %v37_v14, 0.0  ;;  %v59_v21 = vsel %vm54_vm4, %v57_v20, 0.0 }
 0x15e   :  { %v45_v17 = vmul.f32 %v43_v10, %v39_v15 }
 0x160   :  { %v46_v19 = vadd.f32 %v45_v17, %v23_v13 }
 0x162   :  { %v52_v23 = vadd.f32 %v51_v18, %v46_v19 }
 0x169   :  { %v62_v22 = vpop.permute.xlu1 %61 }
 0x16a   :  { %v64_v24 = vmul.f32 %v62_v22, %v59_v21 }
 0x16c   :  { %v65_v25 = vadd.f32 %v64_v24, %v52_v23 }
 0x16e   :  { %67 = vst.msk [vmem:[#allocation2] sm:$0xff] %vm66_vm5, %v65_v25 }
 0x16f   :  { %104 = shalt.err (!%p101_p4)
}
 0x170   :  { %77 = dma.vmem_to_hbm [thread:$0]  %s75_s19, 128, %s157_s3, [#allocation3]  }
 0x171   :  { %113 = dma.done.wait [#allocation3], 128  }
 0x172   :  { %114 = vsyncadd [#allocation3], 4294967168 }
 0x173   :  { %81 = vsyncpa [#allocation3], 1 }

</bundles_post_ra>
